<compile_context>
chip_gen: v7x
topology: tpu7x:2x2x1
jax: 0.10.0
libtpu: 0.0.40
codegen_flags: <defaults>
</compile_context>

<pallas_src>
import functools

import jax
import jax.numpy as jnp
from jax.experimental import pallas as pl
from jax.experimental.pallas import tpu as pltpu


def _round_up(n, m):
    return ((n + m - 1) // m) * m


def _ran_fused_kernel(
    x_ref,      # [BM, Dp]   input x_t (only consumed at layer 0)
    m_ref,      # [BM, 1]    mask
    c_ref,      # [BM, Dp]   c_{t-1} for this layer (layer dim squeezed)
    w_ref,      # [2Dp, 2Dp] fused gate weights, VMEM-resident across layers
    b_ref,      # [1, 2Dp]   fused gate biases
    c_out_ref,  # [BM, Dp]
    h_out_ref,  # [BM, Dp]   final-layer h (output block constant over layer axis)
    cat_sc,     # VMEM scratch [BM, 2Dp] holding [c_{t-1} | x_t]
    *, hidden, if_tanh,
):
    layer = pl.program_id(1)
    n_layers = pl.num_programs(1)

    # First layer of each batch block: load x_t into the x-half of the slab.
    @pl.when(layer == 0)
    def _():
        cat_sc[:, hidden:] = x_ref[...].astype(jnp.float32)

    # c_{t-1} for this layer always comes from its own HBM block.
    cat_sc[:, :hidden] = c_ref[...].astype(jnp.float32)

    cat = cat_sc[...]                       # [BM, 2Dp]
    c_prev = cat[:, :hidden]
    x = cat[:, hidden:]

    # Single fused MXU matmul -> (pre_i | pre_f), f32 accumulation.
    pre = jnp.dot(cat, w_ref[...], preferred_element_type=jnp.float32) + b_ref[...]
    i_t = jax.nn.sigmoid(pre[:, :hidden])
    f_t = jax.nn.sigmoid(pre[:, hidden:])

    # Additive recurrence (default config: content term is x_t itself).
    c_t = i_t * x + f_t * c_prev

    # Mask blend, fused form: c_prev + m * (c_t - c_prev).
    m = m_ref[...].astype(jnp.float32)      # [BM, 1] broadcasts over lanes
    c_t = c_prev + m * (c_t - c_prev)

    h_t = jnp.tanh(c_t) if if_tanh else c_t

    c_out_ref[...] = c_t.astype(c_out_ref.dtype)

    # Final layer: emit h.  Earlier layers: chain h -> next layer's x in VMEM.
    @pl.when(layer == n_layers - 1)
    def _():
        h_out_ref[...] = h_t.astype(h_out_ref.dtype)

    @pl.when(layer < n_layers - 1)
    def _():
        cat_sc[:, hidden:] = h_t


def _fuse_params(params, D, Dp):
    """Pad each [D, D] weight to [Dp, Dp], stack into [[Wci, Wcf],[Wxi, Wxf]],
    and pre-sum the bias pairs -> ([2Dp, 2Dp], [1, 2Dp])."""
    wci, bci, wxi, bxi, wcf, bcf, wxf, bxf = params

    def padw(w):
        return jnp.pad(w.astype(jnp.float32), ((0, Dp - D), (0, Dp - D)))

    def padb(b):
        return jnp.pad(b.astype(jnp.float32), (0, Dp - D))

    w_top = jnp.concatenate([padw(wci), padw(wcf)], axis=1)   # c rows
    w_bot = jnp.concatenate([padw(wxi), padw(wxf)], axis=1)   # x rows
    w_fused = jnp.concatenate([w_top, w_bot], axis=0)         # [2Dp, 2Dp]
    b_fused = jnp.concatenate(
        [padb(bci) + padb(bxi), padb(bcf) + padb(bxf)]
    ).reshape(1, 2 * Dp)
    return w_fused, b_fused


@functools.partial(jax.jit, static_argnames=("laycnt", "if_tanh"))
def _ran_forward_impl(x_t, x_m, c_stack, params, *, laycnt, if_tanh):
    B, D = x_t.shape
    Dp = _round_up(D, 128)      # lane-align (lane-dense stores, real MXU tiles)
    Bp = _round_up(B, 8)        # sublane-align
    # Batch block: keep one block for small batches; split at 128 rows for
    # larger batches so the "parallel" axis can be sharded across cores.
    BM = 128 if Bp >= 256 else Bp
    Bp = _round_up(Bp, BM)

    x_pad = jnp.pad(x_t.astype(jnp.float32), ((0, Bp - B), (0, Dp - D)))
    m_pad = jnp.pad(x_m.astype(jnp.float32).reshape(B, 1), ((0, Bp - B), (0, 0)))
    c_pad = jnp.pad(c_stack.astype(jnp.float32),
                    ((0, 0), (0, Bp - B), (0, Dp - D)))          # [L, Bp, Dp]
    w_fused, b_fused = _fuse_params(params, D, Dp)

    kernel = functools.partial(_ran_fused_kernel, hidden=Dp, if_tanh=if_tanh)

    c_out, h_out = pl.pallas_call(
        kernel,
        out_shape=(
            jax.ShapeDtypeStruct((laycnt, Bp, Dp), jnp.float32),
            jax.ShapeDtypeStruct((Bp, Dp), jnp.float32),
        ),
        grid=(Bp // BM, laycnt),
        in_specs=[
            pl.BlockSpec((BM, Dp), lambda b, l: (b, 0)),             # x_t
            pl.BlockSpec((BM, 1), lambda b, l: (b, 0)),              # mask
            pl.BlockSpec((None, BM, Dp), lambda b, l: (l, b, 0)),    # c_{t-1}
            pl.BlockSpec((2 * Dp, 2 * Dp), lambda b, l: (0, 0)),     # fused W (resident)
            pl.BlockSpec((1, 2 * Dp), lambda b, l: (0, 0)),          # fused bias
        ],
        out_specs=(
            pl.BlockSpec((None, BM, Dp), lambda b, l: (l, b, 0)),    # c_t per layer
            pl.BlockSpec((BM, Dp), lambda b, l: (b, 0)),             # final h
        ),
        scratch_shapes=[pltpu.VMEM((BM, 2 * Dp), jnp.float32)],      # [c | x] slab
        input_output_aliases={2: 0},     # c_{t-1} buffer reused for c_t output
        compiler_params=pltpu.CompilerParams(
            dimension_semantics=("parallel", "arbitrary")),
    )(x_pad, m_pad, c_pad, w_fused, b_fused)

    return c_out[:, :B, :D], h_out[:B, :D]


def ran_forward(x_t, x_m, c_tm1_layers, params, *, laycnt=1, if_tanh=True):
    """Mirrors RAN.forward (share_weight=True): updates c_tm1 per layer,
    chains h_t -> next layer's x_t, returns (list of c_t per layer, final h_t)."""
    c_stack = jnp.stack(c_tm1_layers, axis=0)
    c_new, h_t = _ran_forward_impl(
        x_t, x_m, c_stack, params, laycnt=laycnt, if_tanh=if_tanh)
    return [c_new[i] for i in range(laycnt)], h_t


def _init_linear_T(key, in_dim, out_dim):
    """nn.Linear-like params, uniform in [-0.01, 0.01] (per docstring),
    weight stored transposed as [in_dim, out_dim] so kernels compute x @ W + b."""
    kw, kb = jax.random.split(key)
    w = jax.random.uniform(kw, (in_dim, out_dim), jnp.float32, -0.01, 0.01)
    b = jax.random.uniform(kb, (out_dim,), jnp.float32, -0.01, 0.01)
    return w, b


def _reference(x_t, x_m, c_tm1_layers, params, laycnt=1, if_tanh=True):
    """Pure-JAX reference of the PyTorch forward for validation."""
    wci, bci, wxi, bxi, wcf, bcf, wxf, bxf = params
    c_out = list(c_tm1_layers)
    for layer in range(laycnt):
        c_prev = c_out[layer]
        i_t = jax.nn.sigmoid(c_prev @ wci + bci + x_t @ wxi + bxi)
        f_t = jax.nn.sigmoid(c_prev @ wcf + bcf + x_t @ wxf + bxf)
        c_t = i_t * x_t + f_t * c_prev
        m = x_m[:, None]
        c_t = m * c_t + (1.0 - m) * c_prev
        h_t = jnp.tanh(c_t) if if_tanh else c_t
        c_out[layer] = c_t
        x_t = h_t
    return c_out, x_t


if __name__ == "__main__":
    key = jax.random.PRNGKey(0)
    B, D = 2, 32          # batch=2, x_size = h_size = 32
    LAYCNT = 2            # exercise the in-kernel layer chain (share_weight=True)

    k_x, k_c0, k_c1, k_m, k_ci, k_xi, k_cf, k_xf = jax.random.split(key, 8)
    x_t = jax.random.normal(k_x, (B, D), jnp.float32)
    c_tm1 = [jax.random.normal(k, (B, D), jnp.float32) for k in (k_c0, k_c1)][:LAYCNT]
    x_m = (jax.random.uniform(k_m, (B,)) > 0.3).astype(jnp.float32)

    wci, bci = _init_linear_T(k_ci, D, D)
    wxi, bxi = _init_linear_T(k_xi, D, D)
    wcf, bcf = _init_linear_T(k_cf, D, D)
    wxf, bxf = _init_linear_T(k_xf, D, D)
    params = (wci, bci, wxi, bxi, wcf, bcf, wxf, bxf)

    c_new, h_t = ran_forward(x_t, x_m, c_tm1, params, laycnt=LAYCNT, if_tanh=True)
    jax.block_until_ready(h_t)
    for c in c_new:
        jax.block_until_ready(c)

    # Validate against pure-JAX reference of the PyTorch semantics.
    c_ref, h_ref = _reference(x_t, x_m, c_tm1, params, laycnt=LAYCNT, if_tanh=True)
    assert jnp.allclose(h_t, h_ref, atol=1e-4, rtol=1e-4), "h mismatch"
    for layer in range(LAYCNT):
        assert jnp.allclose(c_new[layer], c_ref[layer], atol=1e-4, rtol=1e-4), (
            f"c mismatch at layer {layer}")

    print("KERNEL_OK")
</pallas_src>

<mosaic_0001>
module attributes {stable_mosaic.version = 11 : i64} {
  func.func @_ran_fused_kernel(%arg0: i32, %arg1: i32, %arg2: memref<8x128xf32, #tpu.memory_space<vmem>>, %arg3: memref<8x1xf32, #tpu.memory_space<vmem>>, %arg4: memref<1x8x128xf32, #tpu.memory_space<vmem>>, %arg5: memref<256x256xf32, #tpu.memory_space<vmem>>, %arg6: memref<1x256xf32, #tpu.memory_space<vmem>>, %arg7: memref<1x8x128xf32, #tpu.memory_space<vmem>>, %arg8: memref<8x128xf32, #tpu.memory_space<vmem>>, %arg9: memref<8x256xf32, #tpu.memory_space<vmem>>) attributes {dimension_semantics = [#tpu.dimension_semantics<parallel>, #tpu.dimension_semantics<arbitrary>], iteration_bounds = array<i64: 1, 2>, scalar_prefetch = 0 : i64, scratch_operands = 1 : i64, tpu.core_type = #tpu.core_type<tc>, window_params = [{transform_indices = @transform_0, window_bounds = array<i64: 8, 128>}, {transform_indices = @transform_1, window_bounds = array<i64: 8, 1>}, {transform_indices = @transform_2, window_bounds = array<i64: 1, 8, 128>}, {pipeline_mode = #tpu.pipeline_mode<synchronous>, transform_indices = @transform_3, window_bounds = array<i64: 256, 256>}, {pipeline_mode = #tpu.pipeline_mode<synchronous>, transform_indices = @transform_4, window_bounds = array<i64: 1, 256>}, {transform_indices = @transform_5, window_bounds = array<i64: 1, 8, 128>}, {transform_indices = @transform_6, window_bounds = array<i64: 8, 128>}]} {
    %c0_i32 = arith.constant 0 : i32
    %0 = arith.cmpi eq, %arg1, %c0_i32 : i32
    %1 = arith.extui %0 : i1 to i32
    %c0_i32_0 = arith.constant 0 : i32
    %2 = arith.cmpi ne, %1, %c0_i32_0 : i32
    scf.if %2 {
      %c0_21 = arith.constant 0 : index
      %c0_22 = arith.constant 0 : index
      %44 = vector.load %arg2[%c0_21, %c0_22] : memref<8x128xf32, #tpu.memory_space<vmem>>, vector<8x128xf32>
      %c0_23 = arith.constant 0 : index
      %c128 = arith.constant 128 : index
      %45 = vector.load %arg9[%c0_23, %c128] : memref<8x256xf32, #tpu.memory_space<vmem>>, vector<8x128xf32>
      tpu.vector_store %arg9[%c0_23, %c128], %44 {strides = array<i32>} : memref<8x256xf32, #tpu.memory_space<vmem>>, vector<8x128xf32>,
    } else {
    }
    %c0 = arith.constant 0 : index
    %c0_1 = arith.constant 0 : index
    %c0_2 = arith.constant 0 : index
    %3 = vector.load %arg4[%c0, %c0_1, %c0_2] : memref<1x8x128xf32, #tpu.memory_space<vmem>>, vector<1x8x128xf32>
    %4 = vector.shape_cast %3 : vector<1x8x128xf32> to vector<8x128xf32>
    %c0_3 = arith.constant 0 : index
    %c0_4 = arith.constant 0 : index
    %5 = vector.load %arg9[%c0_3, %c0_4] : memref<8x256xf32, #tpu.memory_space<vmem>>, vector<8x128xf32>
    tpu.vector_store %arg9[%c0_3, %c0_4], %4 {strides = array<i32>} : memref<8x256xf32, #tpu.memory_space<vmem>>, vector<8x128xf32>,
    %c0_5 = arith.constant 0 : index
    %c0_6 = arith.constant 0 : index
    %6 = vector.load %arg9[%c0_5, %c0_6] : memref<8x256xf32, #tpu.memory_space<vmem>>, vector<8x256xf32>
    %7 = vector.extract_strided_slice %6 {offsets = [0, 0], sizes = [8, 128], strides = [1, 1]} : vector<8x256xf32> to vector<8x128xf32>
    %8 = vector.extract_strided_slice %6 {offsets = [0, 128], sizes = [8, 128], strides = [1, 1]} : vector<8x256xf32> to vector<8x128xf32>
    %c0_7 = arith.constant 0 : index
    %c0_8 = arith.constant 0 : index
    %9 = vector.load %arg5[%c0_7, %c0_8] : memref<256x256xf32, #tpu.memory_space<vmem>>, vector<256x256xf32>
    %cst = arith.constant dense<0.000000e+00> : vector<8x256xf32>
    %10 = tpu.matmul %6, %9, %cst {dimension_numbers = #tpu.dot_dimension_numbers<[1], [0], [0], [1], [0, 0, 1, 1], [], []>} : vector<8x256xf32>, vector<256x256xf32>, vector<8x256xf32> -> vector<8x256xf32>
    %c0_9 = arith.constant 0 : index
    %c0_10 = arith.constant 0 : index
    %11 = vector.load %arg6[%c0_9, %c0_10] : memref<1x256xf32, #tpu.memory_space<vmem>>, vector<1x256xf32>
    %12 = vector.broadcast %11 : vector<1x256xf32> to vector<8x256xf32>
    %13 = arith.addf %10, %12 : vector<8x256xf32>
    %14 = vector.extract_strided_slice %13 {offsets = [0, 0], sizes = [8, 128], strides = [1, 1]} : vector<8x256xf32> to vector<8x128xf32>
    %15 = arith.negf %14 : vector<8x128xf32>
    %16 = math.exp %15 : vector<8x128xf32>
    %cst_11 = arith.constant 1.000000e+00 : f32
    %17 = vector.broadcast %cst_11 : f32 to vector<8x128xf32>
    %18 = arith.addf %17, %16 : vector<8x128xf32>
    %19 = arith.divf %17, %18 : vector<8x128xf32>
    %20 = vector.extract_strided_slice %13 {offsets = [0, 128], sizes = [8, 128], strides = [1, 1]} : vector<8x256xf32> to vector<8x128xf32>
    %21 = arith.negf %20 : vector<8x128xf32>
    %22 = math.exp %21 : vector<8x128xf32>
    %cst_12 = arith.constant 1.000000e+00 : f32
    %23 = vector.broadcast %cst_12 : f32 to vector<8x128xf32>
    %24 = arith.addf %23, %22 : vector<8x128xf32>
    %25 = arith.divf %23, %24 : vector<8x128xf32>
    %26 = arith.mulf %19, %8 : vector<8x128xf32>
    %27 = arith.mulf %25, %7 : vector<8x128xf32>
    %28 = arith.addf %26, %27 : vector<8x128xf32>
    %c0_13 = arith.constant 0 : index
    %c0_14 = arith.constant 0 : index
    %29 = vector.load %arg3[%c0_13, %c0_14] : memref<8x1xf32, #tpu.memory_space<vmem>>, vector<8x1xf32>
    %30 = arith.subf %28, %7 : vector<8x128xf32>
    %31 = vector.broadcast %29 : vector<8x1xf32> to vector<8x128xf32>
    %32 = arith.mulf %31, %30 : vector<8x128xf32>
    %33 = arith.addf %7, %32 : vector<8x128xf32>
    %34 = math.tanh %33 : vector<8x128xf32>
    %c0_15 = arith.constant 0 : index
    %c0_16 = arith.constant 0 : index
    %c0_17 = arith.constant 0 : index
    %35 = vector.load %arg7[%c0_15, %c0_16, %c0_17] : memref<1x8x128xf32, #tpu.memory_space<vmem>>, vector<1x8x128xf32>
    %36 = vector.shape_cast %35 : vector<1x8x128xf32> to vector<8x128xf32>
    %37 = vector.shape_cast %33 : vector<8x128xf32> to vector<1x8x128xf32>
    tpu.vector_store %arg7[%c0_15, %c0_16, %c0_17], %37 {strides = array<i32>} : memref<1x8x128xf32, #tpu.memory_space<vmem>>, vector<1x8x128xf32>,
    %c1_i32 = arith.constant 1 : i32
    %38 = arith.cmpi eq, %arg1, %c1_i32 : i32
    %39 = arith.extui %38 : i1 to i32
    %c0_i32_18 = arith.constant 0 : i32
    %40 = arith.cmpi ne, %39, %c0_i32_18 : i32
    scf.if %40 {
      %c0_21 = arith.constant 0 : index
      %c0_22 = arith.constant 0 : index
      %44 = vector.load %arg8[%c0_21, %c0_22] : memref<8x128xf32, #tpu.memory_space<vmem>>, vector<8x128xf32>
      tpu.vector_store %arg8[%c0_21, %c0_22], %34 {strides = array<i32>} : memref<8x128xf32, #tpu.memory_space<vmem>>, vector<8x128xf32>,
    } else {
    }
    %c1_i32_19 = arith.constant 1 : i32
    %41 = arith.cmpi slt, %arg1, %c1_i32_19 : i32
    %42 = arith.extui %41 : i1 to i32
    %c0_i32_20 = arith.constant 0 : i32
    %43 = arith.cmpi ne, %42, %c0_i32_20 : i32
    scf.if %43 {
      %c0_21 = arith.constant 0 : index
      %c128 = arith.constant 128 : index
      %44 = vector.load %arg9[%c0_21, %c128] : memref<8x256xf32, #tpu.memory_space<vmem>>, vector<8x128xf32>
      tpu.vector_store %arg9[%c0_21, %c128], %34 {strides = array<i32>} : memref<8x256xf32, #tpu.memory_space<vmem>>, vector<8x128xf32>,
    } else {
    }
    return
  }
  func.func @transform_0(%arg0: i32, %arg1: i32) -> (i32, i32) {
    %c0_i32 = arith.constant 0 : i32
    %c0_i32_0 = arith.constant 0 : i32
    return %arg0, %c0_i32 : i32, i32
  }
  func.func @transform_1(%arg0: i32, %arg1: i32) -> (i32, i32) {
    %c0_i32 = arith.constant 0 : i32
    %c0_i32_0 = arith.constant 0 : i32
    return %arg0, %c0_i32 : i32, i32
  }
  func.func @transform_2(%arg0: i32, %arg1: i32) -> (i32, i32, i32) {
    %c0_i32 = arith.constant 0 : i32
    %c0_i32_0 = arith.constant 0 : i32
    return %arg1, %arg0, %c0_i32 : i32, i32, i32
  }
  func.func @transform_3(%arg0: i32, %arg1: i32) -> (i32, i32) {
    %c0_i32 = arith.constant 0 : i32
    %c0_i32_0 = arith.constant 0 : i32
    %c0_i32_1 = arith.constant 0 : i32
    return %c0_i32, %c0_i32_0 : i32, i32
  }
  func.func @transform_4(%arg0: i32, %arg1: i32) -> (i32, i32) {
    %c0_i32 = arith.constant 0 : i32
    %c0_i32_0 = arith.constant 0 : i32
    %c0_i32_1 = arith.constant 0 : i32
    return %c0_i32, %c0_i32_0 : i32, i32
  }
  func.func @transform_5(%arg0: i32, %arg1: i32) -> (i32, i32, i32) {
    %c0_i32 = arith.constant 0 : i32
    %c0_i32_0 = arith.constant 0 : i32
    return %arg1, %arg0, %c0_i32 : i32, i32, i32
  }
  func.func @transform_6(%arg0: i32, %arg1: i32) -> (i32, i32) {
    %c0_i32 = arith.constant 0 : i32
    %c0_i32_0 = arith.constant 0 : i32
    return %arg0, %c0_i32 : i32, i32
  }
}

</mosaic_0001>

<bundles_post_ra>
// kernel: _ran_forward_impl.1
= control target key start
LH: loop header
LB: loop body
LE: loop exit
PB: predicated region body
PF: predicated region fallthrough
CT: control target
= control target key end

     0   :  { %s826_s21 = smov 0   ;;  %s828_s22 = smov 0   ;;  %s1086_s0 = inlined_call_operand.vmem [shape: f32[8,128], index: 0, kind: input, shape index: {}]   ;;  %s1087_s1 = inlined_call_operand.vmem [shape: f32[8,1], index: 1, kind: input, shape index: {}]   ;;  %s1088_s2 = inlined_call_operand.vmem [shape: f32[2,8,128], index: 2, kind: input, shape index: {}, may-alias: {2,5}]   ;;  %s1089_s3 = inlined_call_operand.vmem [shape: f32[256,256], index: 3, kind: input, shape index: {}]   ;;  %s1090_s4 = inlined_call_operand.vmem [shape: f32[1,256], index: 4, kind: input, shape index: {}]   ;;  %s1091_s5 = inlined_call_operand.vmem [shape: f32[2,8,128], index: 5, kind: output, shape index: {0}, may-alias: {2,5}]   ;;  %s1092_s6 = inlined_call_operand.vmem [shape: f32[8,128], index: 6, kind: output, shape index: {1}]  }
   0x1   :  { %s830_s23 = smov 0  }
   0x2 LB: > { %s26_s24 = sadd.s32 1, %s784_s22  ;;  %p655_p0 = scmp.ge.s32.totalorder %s788_s23, 1  ;;  %s788_s23 = sphi %s830_s23, %s17_s23   ;;  %s784_s22 = sphi %s828_s22, %s1094_s22   ;;  %s780_s21 = sphi %s826_s21, %s1093_s21  }
   0x3   : > { %p27_p1 = scmp.ge.s32.totalorder %s26_s24, 2  ;;  %p251_p2 = scmp.lt.s32.totalorder %s788_s23, 3 }
   0x5   : > { %s1096_s24 = smov (%p27_p1, %s26_s24), 0  ;;  %p252_p3 = pnand %p655_p0, %p251_p2 }
   0x6   : > { %p305_p4 = scmp.lt.s32.totalorder (!%p252_p3), %s780_s21, 1  ;;  %p658_p5 = scmp.ne.s32.totalorder (!%p252_p3), %s780_s21, 0 }
   0x7   : > { %255 = sbr.rel (%p252_p3) target bundleno = 361 (0x169), region = 40 }
   0xe   : > { %s306_s25 = scalar_select %p305_p4, %s780_s21, 1 }
   0xf   : > { %326 = sbr.rel (%p658_p5) target bundleno = 22 (0x16), region = 44  ;;  %v327_v0 = vld [vmem:[%s1086_s0] sm:$0xff] (!%p658_p5) }
  0x10   : > { %s656_s26 = sshll.u32 %s306_s25, 3  ;;  %328 = vst [vmem:[#allocation2 + $0x8] sm:$0xff] (!%p658_p5), %v327_v0 }
  0x11   : > { %s851_s29 = scalar_lea.vmem %s1088_s2, %s656_s26  ;;  %s856_s8 = scalar_lea.vmem %s1091_s5, %s656_s26 }
  0x16 PF: > { %v334_v1 = vld [vmem:[%s1089_s3 + $0x8] sm:$0xff]  ;;  %v336_v2 = vld [vmem:[%s1089_s3 + $0x18] sm:$0xff]  ;;  %v333_v3 = vld [vmem:[%s1089_s3] sm:$0xff]  ;;  %v790_v8 = vmov 0   ;;  %p661_p6 = scmp.ne.s32.totalorder %s780_s21, 1 }
  0x17   : > { %v666_v4 = vpack.c.bf16 %v336_v2, %v334_v1  ;;  %v335_v5 = vld [vmem:[%s1089_s3 + $0x10] sm:$0xff]  ;;  %v338_v6 = vld [vmem:[%s1089_s3 + $0x28] sm:$0xff]  ;;  %v340_v7 = vld [vmem:[%s1089_s3 + $0x38] sm:$0xff]  ;;  %755 = vset.pattern.permute.xlu0 %v790_v8 }
  0x18   : > { %v668_v9 = vpack.c.bf16 %v335_v5, %v333_v3  ;;  %v670_v10 = vpack.c.bf16 %v340_v7, %v338_v6  ;;  %v337_v11 = vld [vmem:[%s1089_s3 + $0x20] sm:$0xff]  ;;  %v339_v12 = vld [vmem:[%s1089_s3 + $0x30] sm:$0xff]  ;;  %v342_v13 = vld [vmem:[%s1089_s3 + $0x48] sm:$0xff] }
  0x19   : > { %667 = vmatprep.subr.bf16.mxu0 %v666_v4  ;;  %v344_v14 = vld [vmem:[%s1089_s3 + $0x58] sm:$0xff]  ;;  %v672_v15 = vpack.c.bf16 %v339_v12, %v337_v11  ;;  %v341_v17 = vld [vmem:[%s1089_s3 + $0x40] sm:$0xff]  ;;  %v343_v18 = vld [vmem:[%s1089_s3 + $0x50] sm:$0xff] }
  0x1a   : > { %669 = vmatpush1.bf16.msra.mxu0 %v668_v9  ;;  %v674_v16 = vpack.c.bf16 %v344_v14, %v342_v13  ;;  %v346_v19 = vld [vmem:[%s1089_s3 + $0x68] sm:$0xff]  ;;  %v348_v20 = vld [vmem:[%s1089_s3 + $0x78] sm:$0xff]  ;;  %v676_v21 = vpack.c.bf16 %v343_v18, %v341_v17  ;;  %v345_v23 = vld [vmem:[%s1089_s3 + $0x60] sm:$0xff] }
  0x1b   : > { %671 = vmatprep.subr.bf16.mxu0 %v670_v10  ;;  %v678_v22 = vpack.c.bf16 %v348_v20, %v346_v19  ;;  %v347_v24 = vld [vmem:[%s1089_s3 + $0x70] sm:$0xff]  ;;  %v350_v25 = vld [vmem:[%s1089_s3 + $0x88] sm:$0xff]  ;;  %v352_v26 = vld [vmem:[%s1089_s3 + $0x98] sm:$0xff] }
  0x1c   : > { %v680_v27 = vpack.c.bf16 %v347_v24, %v345_v23  ;;  %v682_v28 = vpack.c.bf16 %v352_v26, %v350_v25  ;;  %v349_v29 = vld [vmem:[%s1089_s3 + $0x80] sm:$0xff]  ;;  %v351_v30 = vld [vmem:[%s1089_s3 + $0x90] sm:$0xff]  ;;  %v354_v31 = vld [vmem:[%s1089_s3 + $0xa8] sm:$0xff] }
  0x1d   : > { %v356_v32 = vld [vmem:[%s1089_s3 + $0xb8] sm:$0xff]  ;;  %v684_v33 = vpack.c.bf16 %v351_v30, %v349_v29  ;;  %v353_v35 = vld [vmem:[%s1089_s3 + $0xa0] sm:$0xff]  ;;  %v355_v36 = vld [vmem:[%s1089_s3 + $0xb0] sm:$0xff] }
  0x1e   : > { %673 = vmatpush1.bf16.msra.mxu0 %v672_v15  ;;  %v686_v34 = vpack.c.bf16 %v356_v32, %v354_v31  ;;  %v358_v37 = vld [vmem:[%s1089_s3 + $0xc8] sm:$0xff]  ;;  %v360_v38 = vld [vmem:[%s1089_s3 + $0xd8] sm:$0xff]  ;;  %v688_v39 = vpack.c.bf16 %v355_v36, %v353_v35  ;;  %v357_v40 = vld [vmem:[%s1089_s3 + $0xc0] sm:$0xff] }
  0x1f   : > { %675 = vmatprep.subr.bf16.mxu0 %v674_v16  ;;  %v690_v41 = vpack.c.bf16 %v360_v38, %v358_v37  ;;  %v359_v42 = vld [vmem:[%s1089_s3 + $0xd0] sm:$0xff]  ;;  %v946_v43 = vld [vmem:[#allocation2 + $0x8] sm:$0xff]  ;;  %v949_v44 = vld [vmem:[%s851_s29] sm:$0xff]  ;;  %v399_v37 = vlaneseq }
  0x20   : > { %v362_v45 = vld [vmem:[%s1089_s3 + $0xe8] sm:$0xff]  ;;  %v364_v46 = vld [vmem:[%s1089_s3 + $0xf8] sm:$0xff]  ;;  %473 = vmatprep.mubr.f32.mxu0 %v946_v43  ;;  %v495_v47 = vld [vmem:[%s1087_s1] sm:$0xff]  ;;  %v692_v48 = vpack.c.bf16 %v359_v42, %v357_v40 }
  0x21   : > { %499 = vperm.xlu0 %755, %v495_v47   ;;  %v694_v49 = vpack.c.bf16 %v364_v46, %v362_v45  ;;  %v361_v50 = vld [vmem:[%s1089_s3 + $0xe0] sm:$0xff]  ;;  %v363_v51 = vld [vmem:[%s1089_s3 + $0xf0] sm:$0xff]  ;;  %v366_v52 = vld [vmem:[%s1089_s3 + $0x108] sm:$0xff]  ;;  %v400_v38 = vshrl.u32 %v399_v37, 7 }
  0x22   : > { %677 = vmatpush1.bf16.msra.mxu0 %v676_v21  ;;  %v368_v53 = vld [vmem:[%s1089_s3 + $0x118] sm:$0xff]  ;;  %v696_v54 = vpack.c.bf16 %v363_v51, %v361_v50  ;;  %v365_v56 = vld [vmem:[%s1089_s3 + $0x100] sm:$0xff]  ;;  %v367_v57 = vld [vmem:[%s1089_s3 + $0x110] sm:$0xff] }
  0x23   : > { %679 = vmatprep.subr.bf16.mxu0 %v678_v22  ;;  %v698_v55 = vpack.c.bf16 %v368_v53, %v366_v52  ;;  %v370_v58 = vld [vmem:[%s1089_s3 + $0x128] sm:$0xff]  ;;  %v372_v59 = vld [vmem:[%s1089_s3 + $0x138] sm:$0xff]  ;;  %v700_v60 = vpack.c.bf16 %v367_v57, %v365_v56  ;;  %v369_v62 = vld [vmem:[%s1089_s3 + $0x120] sm:$0xff] }
  0x24   : > { %v702_v61 = vpack.c.bf16 %v372_v59, %v370_v58  ;;  %v371_v63 = vld [vmem:[%s1089_s3 + $0x130] sm:$0xff]  ;;  %v374_v0 = vld [vmem:[%s1089_s3 + $0x148] sm:$0xff]  ;;  %v376_v1 = vld [vmem:[%s1089_s3 + $0x158] sm:$0xff] }
  0x25   : > { %v704_v2 = vpack.c.bf16 %v371_v63, %v369_v62  ;;  %v706_v3 = vpack.c.bf16 %v376_v1, %v374_v0  ;;  %v373_v4 = vld [vmem:[%s1089_s3 + $0x140] sm:$0xff]  ;;  %v375_v5 = vld [vmem:[%s1089_s3 + $0x150] sm:$0xff]  ;;  %v378_v6 = vld [vmem:[%s1089_s3 + $0x168] sm:$0xff] }
  0x26   : > { %681 = vmatpush1.bf16.msra.mxu0 %v680_v27  ;;  %v380_v7 = vld [vmem:[%s1089_s3 + $0x178] sm:$0xff]  ;;  %v708_v8 = vpack.c.bf16 %v375_v5, %v373_v4  ;;  %v377_v10 = vld [vmem:[%s1089_s3 + $0x160] sm:$0xff]  ;;  %v379_v11 = vld [vmem:[%s1089_s3 + $0x170] sm:$0xff] }
  0x27   : > { %683 = vmatprep.subr.bf16.mxu0 %v682_v28  ;;  %v710_v9 = vpack.c.bf16 %v380_v7, %v378_v6  ;;  %v382_v12 = vld [vmem:[%s1089_s3 + $0x188] sm:$0xff]  ;;  %v384_v13 = vld [vmem:[%s1089_s3 + $0x198] sm:$0xff]  ;;  %v712_v14 = vpack.c.bf16 %v379_v11, %v377_v10  ;;  %v381_v16 = vld [vmem:[%s1089_s3 + $0x180] sm:$0xff] }
  0x28   : > { %v714_v15 = vpack.c.bf16 %v384_v13, %v382_v12  ;;  %v383_v17 = vld [vmem:[%s1089_s3 + $0x190] sm:$0xff]  ;;  %v386_v18 = vld [vmem:[%s1089_s3 + $0x1a8] sm:$0xff]  ;;  %v388_v19 = vld [vmem:[%s1089_s3 + $0x1b8] sm:$0xff] }
  0x29   : > { %v716_v20 = vpack.c.bf16 %v383_v17, %v381_v16  ;;  %v718_v21 = vpack.c.bf16 %v388_v19, %v386_v18  ;;  %v385_v22 = vld [vmem:[%s1089_s3 + $0x1a0] sm:$0xff]  ;;  %v387_v23 = vld [vmem:[%s1089_s3 + $0x1b0] sm:$0xff]  ;;  %v390_v24 = vld [vmem:[%s1089_s3 + $0x1c8] sm:$0xff] }
  0x2a   : > { %685 = vmatpush1.bf16.msra.mxu0 %v684_v33  ;;  %v392_v25 = vld [vmem:[%s1089_s3 + $0x1d8] sm:$0xff]  ;;  %v720_v26 = vpack.c.bf16 %v387_v23, %v385_v22  ;;  %v389_v28 = vld [vmem:[%s1089_s3 + $0x1c0] sm:$0xff]  ;;  %v391_v29 = vld [vmem:[%s1089_s3 + $0x1d0] sm:$0xff] }
  0x2b   : > { %687 = vmatprep.subr.bf16.mxu0 %v686_v34  ;;  %v722_v27 = vpack.c.bf16 %v392_v25, %v390_v24  ;;  %v394_v30 = vld [vmem:[%s1089_s3 + $0x1e8] sm:$0xff]  ;;  %v396_v31 = vld [vmem:[%s1089_s3 + $0x1f8] sm:$0xff]  ;;  %v724_v32 = vpack.c.bf16 %v391_v29, %v389_v28  ;;  %v393_v34 = vld [vmem:[%s1089_s3 + $0x1e0] sm:$0xff] }
  0x2c   : > { %v726_v33 = vpack.c.bf16 %v396_v31, %v394_v30  ;;  %v395_v35 = vld [vmem:[%s1089_s3 + $0x1f0] sm:$0xff]  ;;  %v397_v40 = vld [vmem:[%s1090_s4] sm:$0x3] }
  0x2d   : > { %v728_v36 = vpack.c.bf16 %v395_v35, %v393_v34 }
  0x2e   : > { %689 = vmatpush1.bf16.msra.mxu0 %v688_v39  ;;  %v401_v39 = vsub.s32 0, %v400_v38 }
  0x2f   : > { %691 = vmatprep.subr.bf16.mxu0 %v690_v41  ;;  %v405_v41 = vsub.s32 1, %v400_v38 }
  0x30   : > { %v402_v42 = vrot.slane %v397_v40, %v401_v39 }
  0x31   : > { %v406_v45 = vrot.slane %v397_v40, %v405_v41 }
  0x32   : > { %693 = vmatpush1.bf16.msra.mxu0 %v692_v48 }
  0x33   : > { %695 = vmatprep.subr.bf16.mxu0 %v694_v49 }
  0x36   : > { %697 = vmatpush1.bf16.msra.mxu0 %v696_v54 }
  0x37   : > { %699 = vmatprep.subr.bf16.mxu0 %v698_v55 }
  0x3a   : > { %701 = vmatpush1.bf16.msra.mxu0 %v700_v60 }
  0x3b   : > { %703 = vmatprep.subr.bf16.mxu0 %v702_v61 }
  0x3e   : > { %705 = vmatpush1.bf16.msra.mxu0 %v704_v2 }
  0x3f   : > { %707 = vmatprep.subr.bf16.mxu0 %v706_v3 }
  0x42   : > { %709 = vmatpush1.bf16.msra.mxu0 %v708_v8 }
  0x43   : > { %711 = vmatprep.subr.bf16.mxu0 %v710_v9 }
  0x46   : > { %713 = vmatpush1.bf16.msra.mxu0 %v712_v14 }
  0x47   : > { %715 = vmatprep.subr.bf16.mxu0 %v714_v15 }
  0x4a   : > { %717 = vmatpush1.bf16.msra.mxu0 %v716_v20 }
  0x4b   : > { %719 = vmatprep.subr.bf16.mxu0 %v718_v21 }
  0x4e   : > { %721 = vmatpush1.bf16.msra.mxu0 %v720_v26 }
  0x4f   : > { %723 = vmatprep.subr.bf16.mxu0 %v722_v27 }
  0x52   : > { %725 = vmatpush1.bf16.msra.mxu0 %v724_v32 }
  0x53   : > { %727 = vmatprep.subr.bf16.mxu0 %v726_v33 }
  0x56   : > { %729 = vmatpush1.bf16.msra.mxu0 %v728_v36 }
  0x59   : > { %474 = vmatmul.mubr.f32.vlgmr.msra.gmra.mrb[0].mxu0 %v949_v44 }
  0xa0   : > { %v500_v61 = vpop.permute.xlu0 %499 }
 0x12c   : > { %v475_v46 = vpop.f32.mrb[0].mxu0 }
 0x12d   : > { %v476_v47 = vadd.f32 %v475_v46, %v402_v42  ;;  %v477_v48 = vpop.f32.mrb[1].mxu0 }
 0x12e   : > { %v478_v49 = vadd.f32 %v477_v48, %v406_v45 }
 0x12f   : > { %v659_v50 = vmul.f32 -1.442695, %v476_v47 }
 0x130   : > { %v660_v51 = vmul.f32 -1.442695, %v478_v49 }
 0x131   : > { %756 = vpow2.f32 %v659_v50 }
 0x132   : > { %758 = vpow2.f32 %v660_v51 }
 0x13b   : > { %v757_v52 = vpop.eup %756 }
 0x13c   : > { %v759_v53 = vpop.eup %758  ;;  %v483_v54 = vadd.f32 1.0, %v757_v52 }
 0x13d   : > { %v489_v55 = vadd.f32 1.0, %v759_v53 }
 0x13e   : > { %760 = vrcp.f32 %v483_v54 }
 0x13f   : > { %762 = vrcp.f32 %v489_v55 }
 0x148   : > { %v761_v56 = vpop.eup %760 }
 0x149   : > { %v763_v57 = vpop.eup %762  ;;  %v492_v58 = vmul.f32 %v761_v56, %v946_v43 }
 0x14a   : > { %v493_v59 = vmul.f32 %v763_v57, %v949_v44 }
 0x14c   : > { %v494_v60 = vadd.f32 %v493_v59, %v492_v58 }
 0x14e   : > { %v496_v62 = vsub.f32 %v494_v60, %v949_v44 }
 0x150   : > { %v502_v63 = vmul.f32 %v500_v61, %v496_v62 }
 0x152   : > { %v503_v0 = vadd.f32 %v502_v63, %v949_v44 }
 0x154   : > { %764 = vtanh.f32 %v503_v0  ;;  %505 = vst [vmem:[%s856_s8] sm:$0xff] %v503_v0 }
 0x158   : > { %509 = sbr.rel (%p661_p6) target bundleno = 352 (0x160), region = 48 }
 0x15e   : > { %v765_v1 = vpop.eup %764 }
 0x15f   : > { %510 = vst [vmem:[%s1092_s6] sm:$0xff] %v765_v1 }
 0x160 PF: > { %p662_p7 = scmp.ge.s32.totalorder %s780_s21, 1 }
 0x161   : > { %515 = vst [vmem:[#allocation2 + $0x8] sm:$0xff] (!%p662_p7), %v765_v1 }
 0x162   : > { %514 = sbr.rel (%p662_p7) target bundleno = 361 (0x169), region = 52 }
 0x169 PF: > { %s17_s23 = sadd.s32 1, %s788_s23   ;;  %s1093_s21 = smov %s784_s22 }
 0x16a   : > { %p14_p8 = scmp.ge.s32.totalorder %s17_s23, 4   ;;  %s1094_s22 = smov %s1096_s24 }
 0x16c   :  { %16 = sbr.rel (!%p14_p8) target bundleno = 2 (0x2), region = 100 }

</bundles_post_ra>
